<compile_context>
chip_gen: v7x
topology: tpu7x:2x2x1
jax: 0.10.0
libtpu: 0.0.40
codegen_flags: <defaults>
</compile_context>

<pallas_src>
import functools

import jax
import jax.numpy as jnp
from jax.experimental import pallas as pl
from jax.experimental.pallas import tpu as pltpu

_MIB = 1024 * 1024


def _round_up(x, m):
    return (x + m - 1) // m * m


def _cdiv(a, b):
    return -(-a // b)


def _vmem_capacity_bytes():
    """Physical VMEM of the attached chip; conservative (v7x, 64 MiB) fallback."""
    try:
        cap = int(getattr(pltpu.get_tpu_info(), "vmem_capacity_bytes"))
        if cap > 0:
            return cap
    except Exception:
        pass
    return 64 * _MIB


def _choose_tile_n(n_out, f2, w3_itemsize, max_tile=16384):
    """Single source of truth for output-layer N tiling.

    Divisor-style ("fewest tiles that fit") selection: padding stays < 128*k
    columns, tiles are lane-dense multiples of 128, and the tile is sized from a
    VMEM budget (double-buffered W3/b3/out) rather than a fixed small constant.
    The grid is kept >= 2 whenever N allows it so the 'parallel' axis can be
    split across v7x's two TensorCores.
    """
    n128 = _round_up(n_out, 128)
    budget = min(_vmem_capacity_bytes() // 3, 40 * _MIB)
    # Per output column, double-buffered: W3 column + b3 column + f32 out rows
    # (allowance for up to ~16 batch rows; actual footprint is checked per call).
    per_col = 2 * (f2 * w3_itemsize + 4) + 128
    tn_cap = min(max_tile, max(128, (budget // per_col) // 128 * 128))
    k = max(_cdiv(n128, tn_cap), 2 if n128 >= 256 else 1)
    tn = _round_up(_cdiv(n128, k), 128)
    n_pad = k * tn
    return tn, n_pad


def _depth_head_kernel(x_ref, w1_ref, t1_ref, w2_ref, t2_ref, w3_ref, b3_ref,
                       o_ref):
    """Fused (Linear+foldedBN+ReLU) x2 -> one N-tile of the output Linear.

    x/w1/t1/w2/t2 are fully VMEM-resident (same block index every step, fetched
    once); w3/b3/out are streamed along N. The tiny hidden layers are recomputed
    per tile, keeping grid steps independent ("parallel"-safe / megacore).
    """
    x = x_ref[...]                                                  # [B,Fin] bf16
    h = jnp.dot(x, w1_ref[...], preferred_element_type=jnp.float32)
    h = jnp.maximum(h + t1_ref[...], 0.0).astype(jnp.bfloat16)      # BN folded
    h = jnp.dot(h, w2_ref[...], preferred_element_type=jnp.float32)
    h = jnp.maximum(h + t2_ref[...], 0.0).astype(jnp.bfloat16)      # BN folded
    o_ref[...] = (jnp.dot(h, w3_ref[...], preferred_element_type=jnp.float32)
                  + b3_ref[...])


def prepare_params(params, batch_size, output_size, eps=1e-5,
                   weight_dtype=jnp.bfloat16):
    """One-time prep (outside the hot path): fold BN, transpose, cast, pad."""
    n_out = output_size[0] * output_size[1]
    f2 = params["w3"].shape[1]
    w3_itemsize = jnp.dtype(weight_dtype).itemsize
    tn, n_pad = _choose_tile_n(n_out, f2, w3_itemsize)

    def fold(w, b, gamma, beta, mean, var):
        wt = w.T.astype(jnp.float32)                  # [F_in, F_out]
        if batch_size > 1:                            # matches `x.size(0) > 1`
            s = gamma / jnp.sqrt(var + eps)           # eval-mode running stats
            shift = b * s + (beta - mean * s)
            wt = wt * s[None, :]
        else:
            shift = b
        return wt.astype(weight_dtype), shift[None, :].astype(jnp.float32)

    w1, t1 = fold(params["w1"], params["b1"], params["bn1_gamma"],
                  params["bn1_beta"], params["bn1_mean"], params["bn1_var"])
    w2, t2 = fold(params["w2"], params["b2"], params["bn2_gamma"],
                  params["bn2_beta"], params["bn2_mean"], params["bn2_var"])

    w3 = params["w3"].T.astype(jnp.float32)           # [F2, n_out]
    b3 = params["b3"][None, :].astype(jnp.float32)
    if n_pad != n_out:                                 # lane-dense output stores
        w3 = jnp.pad(w3, ((0, 0), (0, n_pad - n_out)))
        b3 = jnp.pad(b3, ((0, 0), (0, n_pad - n_out)))
    w3 = w3.astype(weight_dtype)

    return {
        "w1": w1, "t1": t1, "w2": w2, "t2": t2, "w3": w3, "b3": b3,
        "_meta": {"bn_folded": bool(batch_size > 1), "n_out": int(n_out),
                  "tn": int(tn), "n_pad": int(n_pad)},
    }


@functools.partial(jax.jit, static_argnames=("output_size", "tn", "n_pad"))
def _depth_head_fwd(x, arrays, *, output_size, tn, n_pad):
    B = x.shape[0]
    H, W = output_size
    n_out = H * W

    w1, t1 = arrays["w1"], arrays["t1"]
    w2, t2 = arrays["w2"], arrays["t2"]
    w3, b3 = arrays["w3"], arrays["b3"]
    f_in, f1 = w1.shape
    f2 = w2.shape[1]
    assert w3.shape == (f2, n_pad) and n_pad % tn == 0, \
        "prepared params do not match output_size / tiling"
    grid = (n_pad // tn,)

    x_bf = x.astype(w1.dtype)

    # VMEM limit from the actual footprint (+4 MiB headroom), not a hard-coded cap.
    resident_bytes = 2 * sum(a.size * a.dtype.itemsize
                             for a in (x_bf, w1, t1, w2, t2))
    streamed_bytes = 2 * tn * (f2 * w3.dtype.itemsize + b3.dtype.itemsize + B * 4)
    vmem_limit = max(int(resident_bytes + streamed_bytes) + 4 * _MIB, 16 * _MIB)

    flops = 2 * B * (f_in * f1 + f1 * f2 + f2 * n_pad)
    bytes_accessed = (x_bf.size * x_bf.dtype.itemsize
                      + sum(a.size * a.dtype.itemsize
                            for a in (w1, t1, w2, t2, w3, b3))
                      + B * n_pad * 4)

    rep = lambda j: (0, 0)  # resident operands: same block every grid step
    out_flat = pl.pallas_call(
        _depth_head_kernel,
        out_shape=jax.ShapeDtypeStruct((B, n_pad), jnp.float32),
        grid_spec=pltpu.PrefetchScalarGridSpec(
            num_scalar_prefetch=0,
            grid=grid,
            in_specs=[
                pl.BlockSpec((B, f_in), rep),               # x   (resident)
                pl.BlockSpec((f_in, f1), rep),              # W1' (resident)
                pl.BlockSpec((1, f1), rep),                 # t1'
                pl.BlockSpec((f1, f2), rep),                # W2'
                pl.BlockSpec((1, f2), rep),                 # t2'
                pl.BlockSpec((f2, tn), lambda j: (0, j)),   # W3  (streamed)
                pl.BlockSpec((1, tn), lambda j: (0, j)),    # b3
            ],
            out_specs=pl.BlockSpec((B, tn), lambda j: (0, j)),
        ),
        compiler_params=pltpu.CompilerParams(
            dimension_semantics=("parallel",),              # megacore on v7x
            vmem_limit_bytes=vmem_limit,
        ),
        cost_estimate=pl.CostEstimate(flops=flops, transcendentals=0,
                                      bytes_accessed=bytes_accessed),
    )(x_bf, w1, t1, w2, t2, w3, b3)

    return out_flat[:, :n_out].reshape(B, 1, H, W)


def depth_estimation_head(x, prepared, output_size):
    """Per-frame forward: single fused pallas_call, N-tiled output layer.

    Note: amortizing W3 streaming over a larger batch (B >= 8) is the biggest
    throughput lever if the caller can group frames before calling this.
    """
    meta = prepared["_meta"]
    if (x.shape[0] > 1) != meta["bn_folded"]:
        raise ValueError(
            "Params were prepared for batch_size %s (BN %s), but x has batch %d; "
            "re-run prepare_params for this batch size to match PyTorch's "
            "per-call `x.size(0) > 1` BatchNorm gate."
            % (">1" if meta["bn_folded"] else "==1",
               "folded" if meta["bn_folded"] else "skipped", x.shape[0]))
    if output_size[0] * output_size[1] != meta["n_out"]:
        raise ValueError("output_size does not match prepared params")
    arrays = {k: v for k, v in prepared.items() if k != "_meta"}
    return _depth_head_fwd(x, arrays, output_size=tuple(output_size),
                           tn=meta["tn"], n_pad=meta["n_pad"])


def init_params(key, combined_feature_size, layer_sizes, output_size):
    """Deterministic synthetic parameters (shapes follow the PyTorch module)."""
    f_in = combined_feature_size
    f1, f2 = layer_sizes
    f_out = output_size[0] * output_size[1]
    keys = jax.random.split(key, 6)

    def lin(k, out_f, in_f):
        kw, kb = jax.random.split(k)
        w = jax.random.normal(kw, (out_f, in_f), jnp.float32) * 0.02
        b = jax.random.normal(kb, (out_f,), jnp.float32) * 0.01
        return w, b

    w1, b1 = lin(keys[0], f1, f_in)
    w2, b2 = lin(keys[1], f2, f1)
    w3, b3 = lin(keys[2], f_out, f2)

    def bn(k, f):
        k1, k2, k3, k4 = jax.random.split(k, 4)
        gamma = 1.0 + 0.1 * jax.random.normal(k1, (f,), jnp.float32)
        beta = 0.1 * jax.random.normal(k2, (f,), jnp.float32)
        mean = 0.05 * jax.random.normal(k3, (f,), jnp.float32)
        var = 1.0 + 0.1 * jax.nn.softplus(jax.random.normal(k4, (f,), jnp.float32))
        return gamma, beta, mean, var

    g1, be1, m1, v1 = bn(keys[3], f1)
    g2, be2, m2, v2 = bn(keys[4], f2)

    return {
        "w1": w1, "b1": b1,
        "bn1_gamma": g1, "bn1_beta": be1, "bn1_mean": m1, "bn1_var": v1,
        "w2": w2, "b2": b2,
        "bn2_gamma": g2, "bn2_beta": be2, "bn2_mean": m2, "bn2_var": v2,
        "w3": w3, "b3": b3,
    }


def reference_forward(x, params, output_size):
    """Full-precision pure-JAX reference of the PyTorch eval-mode forward."""
    B = x.shape[0]
    eps = 1e-5

    def block(h, w, b, g, be, m, v):
        h = h @ w.T + b
        if B > 1:
            h = g * (h - m) / jnp.sqrt(v + eps) + be
        return jnp.maximum(h, 0.0)  # Dropout == identity at eval

    h = block(x, params["w1"], params["b1"], params["bn1_gamma"],
              params["bn1_beta"], params["bn1_mean"], params["bn1_var"])
    h = block(h, params["w2"], params["b2"], params["bn2_gamma"],
              params["bn2_beta"], params["bn2_mean"], params["bn2_var"])
    out = h @ params["w3"].T + params["b3"]
    return out.reshape(B, 1, *output_size)


def prepared_reference(x, prepared, output_size):
    """Numerics-matched reference (same folding / bf16 casts / f32 accumulation)."""
    B = x.shape[0]
    n_out = output_size[0] * output_size[1]
    dt = prepared["w1"].dtype
    h = jnp.dot(x.astype(dt), prepared["w1"],
                preferred_element_type=jnp.float32) + prepared["t1"]
    h = jnp.maximum(h, 0.0).astype(dt)
    h = jnp.dot(h, prepared["w2"],
                preferred_element_type=jnp.float32) + prepared["t2"]
    h = jnp.maximum(h, 0.0).astype(dt)
    out = jnp.dot(h, prepared["w3"],
                  preferred_element_type=jnp.float32) + prepared["b3"]
    return out[:, :n_out].reshape(B, 1, *output_size)


if __name__ == "__main__":
    # Small shapes consistent with the module's constructor arguments.
    batch = 8                      # B >= 8 fills more MXU rows / output sublanes
    combined_feature_size = 32
    layer_sizes = (128, 64)
    output_size = (16, 16)

    key = jax.random.PRNGKey(0)
    k_params, k_x = jax.random.split(key)
    params = init_params(k_params, combined_feature_size, layer_sizes, output_size)
    x = jax.random.normal(k_x, (batch, combined_feature_size), jnp.float32)

    # One-time prep (BN fold, transpose, bf16 cast, tile selection) -- not per frame.
    prepared = prepare_params(params, batch, output_size)

    out = depth_estimation_head(x, prepared, output_size)
    out = jax.block_until_ready(out)
    assert out.shape == (batch, 1, *output_size), out.shape

    # Tight check against a reference with identical (bf16-in / f32-acc) numerics.
    ref_matched = prepared_reference(x, prepared, output_size)
    err_m = float(jnp.max(jnp.abs(out - ref_matched)))
    assert jnp.allclose(out, ref_matched, atol=1e-4, rtol=1e-4), err_m

    # Semantic check against the full-precision PyTorch-equivalent forward
    # (bf16 weight quantization accounts for the small residual).
    ref_f32 = reference_forward(x, params, output_size)
    err_f = float(jnp.max(jnp.abs(out - ref_f32)))
    assert jnp.allclose(out, ref_f32, atol=5e-3, rtol=5e-3), err_f

    print("KERNEL_OK")
</pallas_src>

<mosaic_0001>
module attributes {stable_mosaic.version = 11 : i64} {
  func.func @_depth_head_kernel(%arg0: i32, %arg1: memref<8x32xbf16, #tpu.memory_space<vmem>>, %arg2: memref<32x128xbf16, #tpu.memory_space<vmem>>, %arg3: memref<1x128xf32, #tpu.memory_space<vmem>>, %arg4: memref<128x64xbf16, #tpu.memory_space<vmem>>, %arg5: memref<1x64xf32, #tpu.memory_space<vmem>>, %arg6: memref<64x128xbf16, #tpu.memory_space<vmem>>, %arg7: memref<1x128xf32, #tpu.memory_space<vmem>>, %arg8: memref<8x128xf32, #tpu.memory_space<vmem>>) attributes {dimension_semantics = [#tpu.dimension_semantics<parallel>], iteration_bounds = array<i64: 2>, scalar_prefetch = 0 : i64, scratch_operands = 0 : i64, tpu.core_type = #tpu.core_type<tc>, window_params = [{pipeline_mode = #tpu.pipeline_mode<synchronous>, transform_indices = @transform_0, window_bounds = array<i64: 8, 32>}, {pipeline_mode = #tpu.pipeline_mode<synchronous>, transform_indices = @transform_1, window_bounds = array<i64: 32, 128>}, {pipeline_mode = #tpu.pipeline_mode<synchronous>, transform_indices = @transform_2, window_bounds = array<i64: 1, 128>}, {pipeline_mode = #tpu.pipeline_mode<synchronous>, transform_indices = @transform_3, window_bounds = array<i64: 128, 64>}, {pipeline_mode = #tpu.pipeline_mode<synchronous>, transform_indices = @transform_4, window_bounds = array<i64: 1, 64>}, {transform_indices = @transform_5, window_bounds = array<i64: 64, 128>}, {transform_indices = @transform_6, window_bounds = array<i64: 1, 128>}, {transform_indices = @transform_7, window_bounds = array<i64: 8, 128>}]} {
    %c0 = arith.constant 0 : index
    %c0_0 = arith.constant 0 : index
    %0 = vector.load %arg1[%c0, %c0_0] : memref<8x32xbf16, #tpu.memory_space<vmem>>, vector<8x32xbf16>
    %c0_1 = arith.constant 0 : index
    %c0_2 = arith.constant 0 : index
    %1 = vector.load %arg2[%c0_1, %c0_2] : memref<32x128xbf16, #tpu.memory_space<vmem>>, vector<32x128xbf16>
    %cst = arith.constant dense<0.000000e+00> : vector<8x128xf32>
    %2 = tpu.matmul %0, %1, %cst {dimension_numbers = #tpu.dot_dimension_numbers<[1], [0], [0], [1], [0, 0, 1, 1], [], []>} : vector<8x32xbf16>, vector<32x128xbf16>, vector<8x128xf32> -> vector<8x128xf32>
    %c0_3 = arith.constant 0 : index
    %c0_4 = arith.constant 0 : index
    %3 = vector.load %arg3[%c0_3, %c0_4] : memref<1x128xf32, #tpu.memory_space<vmem>>, vector<1x128xf32>
    %4 = vector.broadcast %3 : vector<1x128xf32> to vector<8x128xf32>
    %5 = arith.addf %2, %4 : vector<8x128xf32>
    %cst_5 = arith.constant 0.000000e+00 : f32
    %6 = vector.broadcast %cst_5 : f32 to vector<8x128xf32>
    %7 = arith.maximumf %5, %6 : vector<8x128xf32>
    %8 = arith.truncf %7 : vector<8x128xf32> to vector<8x128xbf16>
    %c0_6 = arith.constant 0 : index
    %c0_7 = arith.constant 0 : index
    %9 = vector.load %arg4[%c0_6, %c0_7] : memref<128x64xbf16, #tpu.memory_space<vmem>>, vector<128x64xbf16>
    %cst_8 = arith.constant dense<0.000000e+00> : vector<8x64xf32>
    %10 = tpu.matmul %8, %9, %cst_8 {dimension_numbers = #tpu.dot_dimension_numbers<[1], [0], [0], [1], [0, 0, 1, 1], [], []>} : vector<8x128xbf16>, vector<128x64xbf16>, vector<8x64xf32> -> vector<8x64xf32>
    %c0_9 = arith.constant 0 : index
    %c0_10 = arith.constant 0 : index
    %11 = vector.load %arg5[%c0_9, %c0_10] : memref<1x64xf32, #tpu.memory_space<vmem>>, vector<1x64xf32>
    %12 = vector.broadcast %11 : vector<1x64xf32> to vector<8x64xf32>
    %13 = arith.addf %10, %12 : vector<8x64xf32>
    %cst_11 = arith.constant 0.000000e+00 : f32
    %14 = vector.broadcast %cst_11 : f32 to vector<8x64xf32>
    %15 = arith.maximumf %13, %14 : vector<8x64xf32>
    %16 = arith.truncf %15 : vector<8x64xf32> to vector<8x64xbf16>
    %c0_12 = arith.constant 0 : index
    %c0_13 = arith.constant 0 : index
    %17 = vector.load %arg6[%c0_12, %c0_13] : memref<64x128xbf16, #tpu.memory_space<vmem>>, vector<64x128xbf16>
    %cst_14 = arith.constant dense<0.000000e+00> : vector<8x128xf32>
    %18 = tpu.matmul %16, %17, %cst_14 {dimension_numbers = #tpu.dot_dimension_numbers<[1], [0], [0], [1], [0, 0, 1, 1], [], []>} : vector<8x64xbf16>, vector<64x128xbf16>, vector<8x128xf32> -> vector<8x128xf32>
    %c0_15 = arith.constant 0 : index
    %c0_16 = arith.constant 0 : index
    %19 = vector.load %arg7[%c0_15, %c0_16] : memref<1x128xf32, #tpu.memory_space<vmem>>, vector<1x128xf32>
    %20 = vector.broadcast %19 : vector<1x128xf32> to vector<8x128xf32>
    %21 = arith.addf %18, %20 : vector<8x128xf32>
    %c0_17 = arith.constant 0 : index
    %c0_18 = arith.constant 0 : index
    %22 = vector.load %arg8[%c0_17, %c0_18] : memref<8x128xf32, #tpu.memory_space<vmem>>, vector<8x128xf32>
    tpu.vector_store %arg8[%c0_17, %c0_18], %21 {strides = array<i32>} : memref<8x128xf32, #tpu.memory_space<vmem>>, vector<8x128xf32>,
    return
  }
  func.func @transform_0(%arg0: i32) -> (i32, i32) {
    %c0_i32 = arith.constant 0 : i32
    %c0_i32_0 = arith.constant 0 : i32
    %c0_i32_1 = arith.constant 0 : i32
    return %c0_i32, %c0_i32_0 : i32, i32
  }
  func.func @transform_1(%arg0: i32) -> (i32, i32) {
    %c0_i32 = arith.constant 0 : i32
    %c0_i32_0 = arith.constant 0 : i32
    %c0_i32_1 = arith.constant 0 : i32
    return %c0_i32, %c0_i32_0 : i32, i32
  }
  func.func @transform_2(%arg0: i32) -> (i32, i32) {
    %c0_i32 = arith.constant 0 : i32
    %c0_i32_0 = arith.constant 0 : i32
    %c0_i32_1 = arith.constant 0 : i32
    return %c0_i32, %c0_i32_0 : i32, i32
  }
  func.func @transform_3(%arg0: i32) -> (i32, i32) {
    %c0_i32 = arith.constant 0 : i32
    %c0_i32_0 = arith.constant 0 : i32
    %c0_i32_1 = arith.constant 0 : i32
    return %c0_i32, %c0_i32_0 : i32, i32
  }
  func.func @transform_4(%arg0: i32) -> (i32, i32) {
    %c0_i32 = arith.constant 0 : i32
    %c0_i32_0 = arith.constant 0 : i32
    %c0_i32_1 = arith.constant 0 : i32
    return %c0_i32, %c0_i32_0 : i32, i32
  }
  func.func @transform_5(%arg0: i32) -> (i32, i32) {
    %c0_i32 = arith.constant 0 : i32
    %c0_i32_0 = arith.constant 0 : i32
    return %c0_i32, %arg0 : i32, i32
  }
  func.func @transform_6(%arg0: i32) -> (i32, i32) {
    %c0_i32 = arith.constant 0 : i32
    %c0_i32_0 = arith.constant 0 : i32
    return %c0_i32, %arg0 : i32, i32
  }
  func.func @transform_7(%arg0: i32) -> (i32, i32) {
    %c0_i32 = arith.constant 0 : i32
    %c0_i32_0 = arith.constant 0 : i32
    return %c0_i32, %arg0 : i32, i32
  }
}

</mosaic_0001>

<bundles_post_ra>
// kernel: _depth_head_fwd.1
= control target key start
LH: loop header
LB: loop body
LE: loop exit
PB: predicated region body
PF: predicated region fallthrough
CT: control target
= control target key end

     0   :  { %s889_s24 = smov 0   ;;  %s891_s25 = smov 0   ;;  %s988_s0 = inlined_call_operand.vmem [shape: bf16[8,32], index: 0, kind: input, shape index: {}]   ;;  %s989_s1 = inlined_call_operand.vmem [shape: bf16[32,128], index: 1, kind: input, shape index: {}]   ;;  %s990_s2 = inlined_call_operand.vmem [shape: f32[1,128], index: 2, kind: input, shape index: {}]   ;;  %s991_s3 = inlined_call_operand.vmem [shape: bf16[128,64], index: 3, kind: input, shape index: {}]   ;;  %s992_s4 = inlined_call_operand.vmem [shape: f32[1,64], index: 4, kind: input, shape index: {}]   ;;  %s993_s5 = inlined_call_operand.vmem [shape: bf16[64,256], index: 5, kind: input, shape index: {}]   ;;  %s994_s6 = inlined_call_operand.vmem [shape: f32[1,256], index: 6, kind: input, shape index: {}]   ;;  %s995_s7 = inlined_call_operand.vmem [shape: f32[8,256], index: 7, kind: output, shape index: {}]  }
   0x1   :  { %s893_s26 = smov 0  }
   0x2 LB: > { %s696_s27 = sadd.s32 4294967295, %s845_s26   ;;  %s906_s28 = sadd.s32 1, %s845_s26   ;;  %s845_s26 = sphi %s893_s26, %s998_s26   ;;  %s841_s25 = sphi %s891_s25, %s997_s25   ;;  %s837_s24 = sphi %s889_s24, %s996_s24  }
   0x3   : > { %s126_s29 = ssub.s32 %s845_s26, %s906_s28  ;;  %s129_s30 = sadd.s32 1, %s841_s25 }
   0x4   : > { %p127_p0 = scmp.eq.s32.totalorder %s126_s29, 0  ;;  %p136_p1 = scmp.ne.s32.totalorder %s841_s25, %s837_s24 }
   0x5   : > { %p137_p2 = scmp.eq.s32.totalorder %s845_s26, 0  ;;  %p699_p4 = scmp.ge.s32.totalorder %s845_s26, 2 }
   0x6   : > { %s915_s8 = scalar_select %p127_p0, %s841_s25, %s129_s30  }
   0x7   : > { %p138_p3 = por %p137_p2, %p136_p1  ;;  %229 = sbr.rel (%p699_p4) target bundleno = 23 (0x17), region = 36 }
   0xe   : > { %232 = sbr.rel (!%p138_p3) target bundleno = 23 (0x17), region = 40  ;;  %s234_s9 = sand.u32 (%p138_p3), 1, %s841_s25  }
   0xf   : > { %s701_s10 = sshll.u32 (%p138_p3), %s845_s26, 2  ;;  %s700_s11 = sshll.u32 (%p138_p3), %s234_s9, 5 }
  0x10   : > { %s238_s14 = scalar_lea.vmem (%p138_p3), %s993_s5, %s701_s10  ;;  %s236_s15 = scalar_lea.vmem (%p138_p3), [#allocation2], %s700_s11 }
  0x11   : > { %v254_v0 = vld [vmem:[%s238_s14] sm:$0xf] (%p138_p3)  ;;  %v256_v1 = vld [vmem:[%s238_s14 + $0x8] sm:$0xf] (%p138_p3)  ;;  %v258_v2 = vld [vmem:[%s238_s14 + $0x10] sm:$0xf] (%p138_p3) }
  0x12   : > { %255 = vst [vmem:[%s236_s15] sm:$0xf] (%p138_p3), %v254_v0  ;;  %257 = vst [vmem:[%s236_s15 + $0x4] sm:$0xf] (%p138_p3), %v256_v1  ;;  %v260_v3 = vld [vmem:[%s238_s14 + $0x18] sm:$0xf] (%p138_p3) }
  0x13   : > { %v262_v4 = vld [vmem:[%s238_s14 + $0x20] sm:$0xf] (%p138_p3)  ;;  %259 = vst [vmem:[%s236_s15 + $0x8] sm:$0xf] (%p138_p3), %v258_v2  ;;  %261 = vst [vmem:[%s236_s15 + $0xc] sm:$0xf] (%p138_p3), %v260_v3 }
  0x14   : > { %263 = vst [vmem:[%s236_s15 + $0x10] sm:$0xf] (%p138_p3), %v262_v4  ;;  %v264_v5 = vld [vmem:[%s238_s14 + $0x28] sm:$0xf] (%p138_p3)  ;;  %v266_v6 = vld [vmem:[%s238_s14 + $0x30] sm:$0xf] (%p138_p3) }
  0x15   : > { %v268_v7 = vld [vmem:[%s238_s14 + $0x38] sm:$0xf]  ;;  %265 = vst [vmem:[%s236_s15 + $0x14] sm:$0xf] %v264_v5  ;;  %267 = vst [vmem:[%s236_s15 + $0x18] sm:$0xf] %v266_v6 }
  0x16   : > { %269 = vst [vmem:[%s236_s15 + $0x1c] sm:$0xf] %v268_v7 }
  0x17 PF: > { %p702_p5 = scmp.ge.s32.totalorder %s845_s26, 1  ;;  %p313_p6 = scmp.lt.s32.totalorder %s845_s26, 3 }
  0x19   : > { %p314_p7 = pnand %p702_p5, %p313_p6 }
  0x1a   : > { %v809_v8 = vld [vmem:[%s989_s1] sm:$0xff] (!%p314_p7)   ;;  %v847_v9 = vmov (!%p314_p7), 0.0   ;;  %v810_v10 = vld [vmem:[%s989_s1 + $0x8] sm:$0xff] (!%p314_p7)   ;;  %vm848_vm0 = vmmov (!%p314_p7), 0   ;;  %vm385_vm1 = vcmask (!%p314_p7), 261120   ;;  %v813_v14 = vld [vmem:[%s991_s3 + $0x10] sm:$0xff] (!%p314_p7)  }
  0x1b   : > { %317 = sbr.rel (%p314_p7) target bundleno = 686 (0x2ae), region = 85  ;;  %743 = vmatprep.subr.bf16.mxu0 (!%p314_p7), %v847_v9  ;;  %751 = vmatprep.subr.bf16.mxu1 (!%p314_p7), %v847_v9  ;;  %v811_v11 = vld [vmem:[%s991_s3] sm:$0xff] (!%p314_p7)   ;;  %v812_v12 = vld [vmem:[%s991_s3 + $0x8] sm:$0xff] (!%p314_p7)   ;;  %v814_v15 = vld [vmem:[%s991_s3 + $0x18] sm:$0xff] (!%p314_p7)   ;;  %s320_s21 = sand.u32 (!%p314_p7), 1, %s837_s24   ;;  %vm583_vm2 = vcmask (!%p314_p7), 523264  }
  0x1c   : > { %744 = vmatpush3.bf16.msra.mxu0 (!%p314_p7), %v809_v8  ;;  %747 = vmatprep.mubr.msk.bf16.mxu0 (!%p314_p7), %vm848_vm0, %v847_v9  ;;  %v361_v13 = vld [vmem:[%s988_s0] sm:$0xf] (!%p314_p7)  ;;  %v816_v17 = vld [vmem:[%s991_s3 + $0x28] sm:$0xff] (!%p314_p7)   ;;  %v817_v18 = vld [vmem:[%s991_s3 + $0x30] sm:$0xff] (!%p314_p7)   ;;  %s703_s22 = sshll.u32 (!%p314_p7), %s320_s21, 5  ;;  %p353_p8 = scmp.lt.s32.totalorder (!%p314_p7), %s696_s27, 1 }
  0x1d   : > { %745 = vmatprep.subr.bf16.mxu0 (!%p314_p7), %v847_v9  ;;  %767 = vmatprep.mubr.msk.bf16.mxu1 (!%p314_p7), %vm848_vm0, %v847_v9  ;;  %v815_v16 = vld [vmem:[%s991_s3 + $0x20] sm:$0xff] (!%p314_p7)   ;;  %v818_v19 = vld [vmem:[%s991_s3 + $0x38] sm:$0xff] (!%p314_p7)   ;;  %s322_s23 = scalar_lea.vmem (!%p314_p7), [#allocation2], %s703_s22 }
  0x1e   : > { %752 = vmatpush3.bf16.msra.mxu1 (!%p314_p7), %v811_v11  ;;  %v819_v20 = vld [vmem:[%s322_s23] sm:$0xff] (!%p314_p7)   ;;  %v820_v21 = vld [vmem:[%s322_s23 + $0x8] sm:$0xff] (!%p314_p7)   ;;  %v705_v22 = vld [vmem:[%s990_s2] ss:$0 sm:$0xff] (!%p314_p7) }
  0x1f   : > { %753 = vmatprep.subr.bf16.mxu1 (!%p314_p7), %v847_v9  ;;  %v821_v30 = vld [vmem:[%s322_s23 + $0x10] sm:$0xff] (!%p314_p7)   ;;  %v822_v31 = vld [vmem:[%s322_s23 + $0x18] sm:$0xff] (!%p314_p7)  }
  0x20   : > { %746 = vmatpush3.bf16.msra.mxu0 (!%p314_p7), %v810_v10  ;;  %v709_v32 = vld [vmem:[%s992_s4] ss:$0 sm:$0xff] (!%p314_p7) }
  0x21   : > { %771 = vmatprep.subr.bf16.mxu0 (!%p314_p7), %v847_v9 }
  0x22   : > { %754 = vmatpush3.bf16.msra.mxu1 %v812_v12  ;;  %s1000_s27 = smov (!%p353_p8, %s696_s27), 1 }
  0x23   : > { %748 = vmatmul.mubr.msk.bf16.vlgmr.msra.gmra.mrb[0].mxu0 %vm385_vm1, %v361_v13  ;;  %755 = vmatprep.subr.bf16.mxu1 %v847_v9  ;;  %s355_s12 = scalar_lea.vmem %s994_s6, %s1000_s27  ;;  %s704_s13 = sshll.u32 %s1000_s27, 3 }
  0x24   : > { %779 = vmatprep.mubr.msk.bf16.mxu0 %vm848_vm0, %v847_v9  ;;  %772 = vmatpush3.bf16.msra.mxu0 %v819_v20  ;;  %v718_v40 = vld [vmem:[%s355_s12] ss:$0 sm:$0xff]  ;;  %s359_s16 = scalar_lea.vmem %s995_s7, %s704_s13 }
  0x25   : > { %773 = vmatprep.subr.bf16.mxu0 %v847_v9 }
  0x26   : > { %756 = vmatpush3.bf16.msra.mxu1 %v813_v14 }
  0x27   : > { %757 = vmatprep.subr.bf16.mxu1 %v847_v9 }
  0x28   : > { %774 = vmatpush3.bf16.msra.mxu0 %v820_v21 }
  0x29   : > { %775 = vmatprep.subr.bf16.mxu0 %v847_v9 }
  0x2a   : > { %758 = vmatpush3.bf16.msra.mxu1 %v814_v15 }
  0x2b   : > { %759 = vmatprep.subr.bf16.mxu1 %v847_v9 }
  0x2c   : > { %776 = vmatpush3.bf16.msra.mxu0 %v821_v30 }
  0x2d   : > { %777 = vmatprep.subr.bf16.mxu0 %v847_v9 }
  0x2e   : > { %760 = vmatpush3.bf16.msra.mxu1 %v815_v16 }
  0x2f   : > { %761 = vmatprep.subr.bf16.mxu1 %v847_v9 }
  0x30   : > { %778 = vmatpush3.bf16.msra.mxu0 %v822_v31 }
  0x32   : > { %762 = vmatpush3.bf16.msra.mxu1 %v816_v17 }
  0x33   : > { %763 = vmatprep.subr.bf16.mxu1 %v847_v9 }
  0x36   : > { %764 = vmatpush3.bf16.msra.mxu1 %v817_v18 }
  0x37   : > { %765 = vmatprep.subr.bf16.mxu1 %v847_v9 }
  0x3a   : > { %766 = vmatpush3.bf16.msra.mxu1 %v818_v19 }
  0xf6   : > { %v423_v23 = vpop.f32.mrb[0].mxu0 }
  0xf7   : > { %v424_v24 = vadd.f32 %v705_v22, %v423_v23  ;;  %v749_v25 = vpop.f32.mrb[1].mxu0 }
  0xf8   : > { %v426_v26 = vpop.f32.mrb[2].mxu0 }
  0xf9   : > { %v429_v27 = vmax.f32 %v424_v24, 0.0  ;;  %v750_v28 = vpop.f32.mrb[3].mxu0 }
  0xfb   : > { %v430_v29 = vpack.c.bf16 %v429_v27, %v429_v27 }
  0xfd   : > { %768 = vmatmul.mubr.bf16.vlgmr.msra.gmra.mrb[0].mxu1 %v430_v29 }
 0x1d0   : > { %v536_v33 = vpop.f32.mrb[0].mxu1 }
 0x1d1   : > { %v537_v34 = vadd.f32 %v709_v32, %v536_v33  ;;  %v769_v35 = vpop.f32.mrb[1].mxu1 }
 0x1d2   : > { %v539_v36 = vpop.f32.mrb[2].mxu1 }
 0x1d3   : > { %v542_v37 = vmax.f32 %v537_v34, 0.0  ;;  %v770_v38 = vpop.f32.mrb[3].mxu1 }
 0x1d5   : > { %v543_v39 = vpack.c.bf16 %v542_v37, %v542_v37 }
 0x1d7   : > { %780 = vmatmul.mubr.msk.bf16.vlgmr.msra.gmra.mrb[4].mxu0 %vm583_vm2, %v543_v39 }
 0x2aa   : > { %v621_v41 = vpop.f32.mrb[4].mxu0 }
 0x2ab   : > { %v622_v42 = vadd.f32 %v718_v40, %v621_v41  ;;  %v781_v43 = vpop.f32.mrb[5].mxu0 }
 0x2ac   : > { %v624_v44 = vpop.f32.mrb[6].mxu0 }
 0x2ad   : > { %627 = vst [vmem:[%s359_s16] sm:$0xff] %v622_v42  ;;  %v782_v45 = vpop.f32.mrb[7].mxu0 }
 0x2ae PF: > { %p14_p9 = scmp.ge.s32.totalorder %s906_s28, 4   ;;  %s996_s24 = smov %s841_s25 }
 0x2af   : > { %s997_s25 = smov %s915_s8  ;;  %s998_s26 = smov %s906_s28 }
 0x2b0   :  { %16 = sbr.rel (!%p14_p9) target bundleno = 2 (0x2), region = 127 }

</bundles_post_ra>
